<compile_context>
chip_gen: v6e
topology: v6e:2x2x1
jax: 0.10.0
libtpu: 0.0.40
codegen_flags: <defaults>
</compile_context>

<pallas_src>
import jax
import jax.numpy as jnp
from jax import lax
from jax.experimental import pallas as pl
from jax.experimental.pallas import tpu as pltpu


def _round_up(x, m):
    return ((x + m - 1) // m) * m


def _critic_kernel(x_ref, w1_ref, b1_ref, w2_ref, b2_ref, w3_ref, b3_ref, o_ref):
    # x_ref: (tb, S) batch-major state tile (f32 in HBM). Cast once in VMEM.
    x = x_ref[...].astype(w1_ref.dtype)                       # (tb, S)

    # lin1: contract w1 (H1, S) with x (tb, S) over S -> (H1, tb).
    # NT dimension numbers (lhs @ rhs.T) put the batch on the lane axis
    # without an explicit transpose; f32 accumulation on the MXU.
    h1 = lax.dot_general(w1_ref[...], x, (((1,), (1,)), ((), ())),
                         preferred_element_type=jnp.float32)
    h1 = jnp.maximum(h1 + b1_ref[...], 0.0)                   # bias + ReLU (VPU, f32)

    # lin2: (H2, H1) @ (H1, tb) -> (H2, tb), compute dtype in / f32 acc.
    h2 = jnp.dot(w2_ref[...], h1.astype(w2_ref.dtype),
                 preferred_element_type=jnp.float32)
    h2 = jnp.maximum(h2 + b2_ref[...], 0.0)

    # lin3 has out_features == 1: a (tb,256)@(256,1) matmul would use a single
    # MXU result lane, so do a fused VPU multiply + sublane reduction instead.
    # Result is already the lane-dense (1, tb) output row.
    v = jnp.sum(h2 * w3_ref[...], axis=0, keepdims=True) + b3_ref[...]
    o_ref[...] = v.astype(o_ref.dtype)


def critic_forward(state, params, *, tb=512, compute_dtype=jnp.bfloat16):
    """state: (B, state_dim) f32 -> value: (B, 1) f32.

    tb: requested batch tile (lane) width; clamped so grid stays >= 2 when the
        batch allows (v7x megacore) and lane-aligned to 128.
    compute_dtype: MXU input dtype for lin1/lin2 (bf16 recommended;
        accumulation is always f32).
    """
    w1, b1, w2, b2, w3, b3 = params          # PyTorch layout: W (out, in), b (out,)
    B, S = state.shape
    H1 = w1.shape[0]                          # 128
    H2 = w2.shape[0]                          # 256

    # Batch tile: large enough to amortize per-step pipeline overhead, but
    # capped so grid = cdiv(B, tb) keeps >= 2 steps when B allows it.
    tb = max(128, min(int(tb), _round_up(pl.cdiv(B, 2), 128)))
    grid = pl.cdiv(B, tb)
    b_pad = grid * tb

    # Only a cheap batch-dim zero pad when B isn't tile-aligned; no transpose
    # or dtype cast round trip through HBM.
    if b_pad != B:
        state = jnp.pad(state, ((0, b_pad - B), (0, 0)))

    w1k = w1.astype(compute_dtype)                       # (H1, S)
    w2k = w2.astype(compute_dtype)                       # (H2, H1)
    b1k = b1.reshape(H1, 1).astype(jnp.float32)
    b2k = b2.reshape(H2, 1).astype(jnp.float32)
    w3k = w3.reshape(H2, 1).astype(jnp.float32)          # column form for the VPU path
    b3k = b3.reshape(1, 1).astype(jnp.float32)

    def resident(shape):
        # Constant index_map: block index never changes, so Pallas DMAs these
        # once and keeps them VMEM-resident across all grid steps.
        return pl.BlockSpec(shape, lambda i: (0, 0))

    out = pl.pallas_call(
        _critic_kernel,
        out_shape=jax.ShapeDtypeStruct((1, b_pad), jnp.float32),
        grid=(grid,),
        in_specs=[
            pl.BlockSpec((tb, S), lambda i: (i, 0)),     # streamed state tiles
            resident((H1, S)),
            resident((H1, 1)),
            resident((H2, H1)),
            resident((H2, 1)),
            resident((H2, 1)),
            resident((1, 1)),
        ],
        # Sublane block dim (1) == full array dim -> unmasked lane-dense stores.
        out_specs=pl.BlockSpec((1, tb), lambda i: (0, i)),
        compiler_params=pltpu.CompilerParams(
            dimension_semantics=("parallel",)),          # megacore split on v7x
    )(state, w1k, b1k, w2k, b2k, w3k, b3k)

    # (1, b_pad) row-major == padded batch order; slice back to (B, 1).
    return out.reshape(b_pad, 1)[:B]


def init_critic_params(key, state_dim):
    """PyTorch nn.Linear default init: U(-1/sqrt(fan_in), +1/sqrt(fan_in)),
    weights stored (out_features, in_features), biases (out_features,)."""
    dims = [(state_dim, 128), (128, 256), (256, 1)]
    params = []
    for fan_in, fan_out in dims:
        key, kw, kb = jax.random.split(key, 3)
        bound = 1.0 / jnp.sqrt(jnp.float32(fan_in))
        w = jax.random.uniform(kw, (fan_out, fan_in), jnp.float32, -bound, bound)
        b = jax.random.uniform(kb, (fan_out,), jnp.float32, -bound, bound)
        params.extend([w, b])
    return tuple(params)


def critic_forward_ref(state, params):
    w1, b1, w2, b2, w3, b3 = params
    with jax.default_matmul_precision("highest"):
        h1 = jnp.maximum(state @ w1.T + b1, 0.0)
        h2 = jnp.maximum(h1 @ w2.T + b2, 0.0)
        return h2 @ w3.T + b3


if __name__ == "__main__":
    key = jax.random.PRNGKey(0)
    key, k_state = jax.random.split(key)

    # Small shapes consistent with the module (forward only uses state_dim).
    batch = 4
    state_dim = 8
    action_dim = 2          # unused by Critic.forward (kept for parity with __init__)

    state = jax.random.normal(k_state, (batch, state_dim), jnp.float32)
    params = init_critic_params(key, state_dim)
    ref = critic_forward_ref(state, params)

    # f32 MXU path: tight check against the reference.
    out_f32 = jax.block_until_ready(
        critic_forward(state, params, compute_dtype=jnp.float32))
    assert out_f32.shape == (batch, 1)
    assert jnp.allclose(out_f32, ref, atol=2e-3, rtol=2e-3)

    # bf16 MXU path (default / what you'd run at scale): loose tolerance.
    out_bf16 = jax.block_until_ready(critic_forward(state, params))
    assert out_bf16.shape == (batch, 1)
    assert jnp.allclose(out_bf16, ref, atol=5e-2, rtol=5e-2)

    # Larger, non-tile-aligned batch: exercises grid > 1 and the padded tail.
    key, k2 = jax.random.split(key)
    state2 = jax.random.normal(k2, (1000, 24), jnp.float32)
    params2 = init_critic_params(key, 24)
    ref2 = critic_forward_ref(state2, params2)

    out2_f32 = jax.block_until_ready(
        critic_forward(state2, params2, compute_dtype=jnp.float32))
    assert out2_f32.shape == (1000, 1)
    assert jnp.allclose(out2_f32, ref2, atol=2e-3, rtol=2e-3)

    out2_bf16 = jax.block_until_ready(critic_forward(state2, params2))
    assert out2_bf16.shape == (1000, 1)
    assert jnp.allclose(out2_bf16, ref2, atol=5e-2, rtol=5e-2)

    print("KERNEL_OK")
</pallas_src>

<mosaic_0001>
module attributes {stable_mosaic.version = 11 : i64} {
  func.func @_critic_kernel(%arg0: i32, %arg1: memref<128x8xf32, #tpu.memory_space<vmem>>, %arg2: memref<128x8xf32, #tpu.memory_space<vmem>>, %arg3: memref<128x1xf32, #tpu.memory_space<vmem>>, %arg4: memref<256x128xf32, #tpu.memory_space<vmem>>, %arg5: memref<256x1xf32, #tpu.memory_space<vmem>>, %arg6: memref<256x1xf32, #tpu.memory_space<vmem>>, %arg7: memref<1x1xf32, #tpu.memory_space<vmem>>, %arg8: memref<1x128xf32, #tpu.memory_space<vmem>>) attributes {dimension_semantics = [#tpu.dimension_semantics<parallel>], iteration_bounds = array<i64: 1>, scalar_prefetch = 0 : i64, scratch_operands = 0 : i64, tpu.core_type = #tpu.core_type<tc>, window_params = [{transform_indices = @transform_0, window_bounds = array<i64: 128, 8>}, {pipeline_mode = #tpu.pipeline_mode<synchronous>, transform_indices = @transform_1, window_bounds = array<i64: 128, 8>}, {pipeline_mode = #tpu.pipeline_mode<synchronous>, transform_indices = @transform_2, window_bounds = array<i64: 128, 1>}, {pipeline_mode = #tpu.pipeline_mode<synchronous>, transform_indices = @transform_3, window_bounds = array<i64: 256, 128>}, {pipeline_mode = #tpu.pipeline_mode<synchronous>, transform_indices = @transform_4, window_bounds = array<i64: 256, 1>}, {pipeline_mode = #tpu.pipeline_mode<synchronous>, transform_indices = @transform_5, window_bounds = array<i64: 256, 1>}, {pipeline_mode = #tpu.pipeline_mode<synchronous>, transform_indices = @transform_6, window_bounds = array<i64: 1, 1>}, {transform_indices = @transform_7, window_bounds = array<i64: 1, 128>}]} {
    %c0 = arith.constant 0 : index
    %c0_0 = arith.constant 0 : index
    %0 = vector.load %arg1[%c0, %c0_0] : memref<128x8xf32, #tpu.memory_space<vmem>>, vector<128x8xf32>
    %c0_1 = arith.constant 0 : index
    %c0_2 = arith.constant 0 : index
    %1 = vector.load %arg2[%c0_1, %c0_2] : memref<128x8xf32, #tpu.memory_space<vmem>>, vector<128x8xf32>
    %cst = arith.constant dense<0.000000e+00> : vector<128x128xf32>
    %2 = tpu.matmul %1, %0, %cst {dimension_numbers = #tpu.dot_dimension_numbers<[1], [1], [0], [0], [0, 0, 1, 0], [], []>} : vector<128x8xf32>, vector<128x8xf32>, vector<128x128xf32> -> vector<128x128xf32>
    %c0_3 = arith.constant 0 : index
    %c0_4 = arith.constant 0 : index
    %3 = vector.load %arg3[%c0_3, %c0_4] : memref<128x1xf32, #tpu.memory_space<vmem>>, vector<128x1xf32>
    %4 = vector.broadcast %3 : vector<128x1xf32> to vector<128x128xf32>
    %5 = arith.addf %2, %4 : vector<128x128xf32>
    %cst_5 = arith.constant 0.000000e+00 : f32
    %6 = vector.broadcast %cst_5 : f32 to vector<128x128xf32>
    %7 = arith.maximumf %5, %6 : vector<128x128xf32>
    %c0_6 = arith.constant 0 : index
    %c0_7 = arith.constant 0 : index
    %8 = vector.load %arg4[%c0_6, %c0_7] : memref<256x128xf32, #tpu.memory_space<vmem>>, vector<256x128xf32>
    %cst_8 = arith.constant dense<0.000000e+00> : vector<256x128xf32>
    %9 = tpu.matmul %8, %7, %cst_8 {dimension_numbers = #tpu.dot_dimension_numbers<[1], [0], [0], [1], [0, 0, 1, 1], [], []>} : vector<256x128xf32>, vector<128x128xf32>, vector<256x128xf32> -> vector<256x128xf32>
    %c0_9 = arith.constant 0 : index
    %c0_10 = arith.constant 0 : index
    %10 = vector.load %arg5[%c0_9, %c0_10] : memref<256x1xf32, #tpu.memory_space<vmem>>, vector<256x1xf32>
    %11 = vector.broadcast %10 : vector<256x1xf32> to vector<256x128xf32>
    %12 = arith.addf %9, %11 : vector<256x128xf32>
    %cst_11 = arith.constant 0.000000e+00 : f32
    %13 = vector.broadcast %cst_11 : f32 to vector<256x128xf32>
    %14 = arith.maximumf %12, %13 : vector<256x128xf32>
    %c0_12 = arith.constant 0 : index
    %c0_13 = arith.constant 0 : index
    %15 = vector.load %arg6[%c0_12, %c0_13] : memref<256x1xf32, #tpu.memory_space<vmem>>, vector<256x1xf32>
    %16 = vector.broadcast %15 : vector<256x1xf32> to vector<256x128xf32>
    %17 = arith.mulf %14, %16 : vector<256x128xf32>
    %cst_14 = arith.constant dense<0.000000e+00> : vector<128xf32>
    %18 = vector.multi_reduction <add>, %17, %cst_14 [0] : vector<256x128xf32> to vector<128xf32>
    %19 = vector.shape_cast %18 : vector<128xf32> to vector<1x128xf32>
    %c0_15 = arith.constant 0 : index
    %c0_16 = arith.constant 0 : index
    %20 = vector.load %arg7[%c0_15, %c0_16] : memref<1x1xf32, #tpu.memory_space<vmem>>, vector<1x1xf32>
    %21 = vector.broadcast %20 : vector<1x1xf32> to vector<1x128xf32>
    %22 = arith.addf %19, %21 : vector<1x128xf32>
    %c0_17 = arith.constant 0 : index
    %c0_18 = arith.constant 0 : index
    %23 = vector.load %arg8[%c0_17, %c0_18] : memref<1x128xf32, #tpu.memory_space<vmem>>, vector<1x128xf32>
    tpu.vector_store %arg8[%c0_17, %c0_18], %22 {strides = array<i32>} : memref<1x128xf32, #tpu.memory_space<vmem>>, vector<1x128xf32>,
    return
  }
  func.func @transform_0(%arg0: i32) -> (i32, i32) {
    %c0_i32 = arith.constant 0 : i32
    %c0_i32_0 = arith.constant 0 : i32
    return %arg0, %c0_i32 : i32, i32
  }
  func.func @transform_1(%arg0: i32) -> (i32, i32) {
    %c0_i32 = arith.constant 0 : i32
    %c0_i32_0 = arith.constant 0 : i32
    %c0_i32_1 = arith.constant 0 : i32
    return %c0_i32, %c0_i32_0 : i32, i32
  }
  func.func @transform_2(%arg0: i32) -> (i32, i32) {
    %c0_i32 = arith.constant 0 : i32
    %c0_i32_0 = arith.constant 0 : i32
    %c0_i32_1 = arith.constant 0 : i32
    return %c0_i32, %c0_i32_0 : i32, i32
  }
  func.func @transform_3(%arg0: i32) -> (i32, i32) {
    %c0_i32 = arith.constant 0 : i32
    %c0_i32_0 = arith.constant 0 : i32
    %c0_i32_1 = arith.constant 0 : i32
    return %c0_i32, %c0_i32_0 : i32, i32
  }
  func.func @transform_4(%arg0: i32) -> (i32, i32) {
    %c0_i32 = arith.constant 0 : i32
    %c0_i32_0 = arith.constant 0 : i32
    %c0_i32_1 = arith.constant 0 : i32
    return %c0_i32, %c0_i32_0 : i32, i32
  }
  func.func @transform_5(%arg0: i32) -> (i32, i32) {
    %c0_i32 = arith.constant 0 : i32
    %c0_i32_0 = arith.constant 0 : i32
    %c0_i32_1 = arith.constant 0 : i32
    return %c0_i32, %c0_i32_0 : i32, i32
  }
  func.func @transform_6(%arg0: i32) -> (i32, i32) {
    %c0_i32 = arith.constant 0 : i32
    %c0_i32_0 = arith.constant 0 : i32
    %c0_i32_1 = arith.constant 0 : i32
    return %c0_i32, %c0_i32_0 : i32, i32
  }
  func.func @transform_7(%arg0: i32) -> (i32, i32) {
    %c0_i32 = arith.constant 0 : i32
    %c0_i32_0 = arith.constant 0 : i32
    return %c0_i32, %arg0 : i32, i32
  }
}

</mosaic_0001>

<bundles_post_ra>
// kernel: tpu_custom_call.1
= control target key start
LH: loop header
LB: loop body
LE: loop exit
PB: predicated region body
PF: predicated region fallthrough
CT: control target
= control target key end

     0   :  { %s2084_s0 = inlined_call_operand.vmem [shape: f32[128,8], index: 0, kind: input, shape index: {}]   ;;  %s2085_s1 = inlined_call_operand.vmem [shape: f32[128,8], index: 1, kind: input, shape index: {}]   ;;  %s2086_s2 = inlined_call_operand.vmem [shape: f32[128,1], index: 2, kind: input, shape index: {}]   ;;  %s2087_s3 = inlined_call_operand.vmem [shape: f32[256,128], index: 3, kind: input, shape index: {}]   ;;  %s2088_s4 = inlined_call_operand.vmem [shape: f32[256,1], index: 4, kind: input, shape index: {}]   ;;  %s2089_s5 = inlined_call_operand.vmem [shape: f32[256,1], index: 5, kind: input, shape index: {}]   ;;  %s2090_s6 = inlined_call_operand.<no memory space> [shape: f32[1,1], index: 6, kind: input, shape index: {}]   ;;  %s2091_s7 = inlined_call_operand.hbm [shape: f32[1,128], index: 7, kind: output, shape index: {}]  }
   0x1   :  { %v12_v0 = vstv %s2090_s6 }
   0x2   :  { %13 = vst [vmem:[#allocation2] sm:$0x1] %v12_v0 }
   0x3   :  { %v44_v1 = vld [vmem:[%s2084_s0 + $0x78] sm:$0xff]  ;;  %vm157_vm0 = vcmask 64512   ;;  %v43_v3 = vld [vmem:[%s2084_s0 + $0x70] sm:$0xff]  ;;  %v1457_v4 = vmov 0   ;;  %v74_v5 = vld [vmem:[%s2086_s2 + $0x68] sm:$0xff] }
   0x4   :  { %v76_v2 = vld [vmem:[%s2086_s2 + $0x78] sm:$0xff]  ;;  %1433 = vset.pattern.permute.xlu0 %v1457_v4  ;;  %1295 = vmatprep.subr.msk.mxu0 %vm157_vm0, %v44_v1  ;;  %v75_v6 = vld [vmem:[%s2086_s2 + $0x70] sm:$0xff]  ;;  %v42_v7 = vld [vmem:[%s2084_s0 + $0x68] sm:$0xff] }
   0x5   :  { %154 = vperm.xlu0 %1433, %v76_v2   ;;  %1296 = vmatpush3.xpose.msk.msra.mxu0 %vm157_vm0, %v44_v1  ;;  %v73_v8 = vld [vmem:[%s2086_s2 + $0x60] sm:$0xff]  ;;  %v72_v9 = vld [vmem:[%s2086_s2 + $0x58] sm:$0xff]  ;;  %v71_v11 = vld [vmem:[%s2086_s2 + $0x50] sm:$0xff] }
   0x6   :  { %1297 = vmatprep.subr.msk.mxu0 %vm157_vm0, %v43_v3  ;;  %1434 = vset.pattern.permute.xlu1 %v1457_v4  ;;  %v41_v10 = vld [vmem:[%s2084_s0 + $0x60] sm:$0xff]  ;;  %v70_v12 = vld [vmem:[%s2086_s2 + $0x48] sm:$0xff]  ;;  %v40_v13 = vld [vmem:[%s2084_s0 + $0x58] sm:$0xff] }
   0x7   :  { %144 = vperm.xlu1 %1434, %v74_v5   ;;  %v69_v14 = vld [vmem:[%s2086_s2 + $0x40] sm:$0xff]  ;;  %v68_v15 = vld [vmem:[%s2086_s2 + $0x38] sm:$0xff]  ;;  %v39_v17 = vld [vmem:[%s2084_s0 + $0x50] sm:$0xff] }
   0x8   :  { %v45_v16 = vld [vmem:[%s2085_s1] sm:$0xff]  ;;  %v67_v18 = vld [vmem:[%s2086_s2 + $0x30] sm:$0xff]  ;;  %v66_v19 = vld [vmem:[%s2086_s2 + $0x28] sm:$0xff] }
   0x9   :  { %149 = vperm.xlu0 %1433, %v75_v6   ;;  %1298 = vmatpush3.xpose.msk.msra.mxu0 %vm157_vm0, %v43_v3  ;;  %v38_v20 = vld [vmem:[%s2084_s0 + $0x48] sm:$0xff]  ;;  %v65_v21 = vld [vmem:[%s2086_s2 + $0x20] sm:$0xff]  ;;  %v64_v22 = vld [vmem:[%s2086_s2 + $0x18] sm:$0xff] }
   0xa   :  { %1299 = vmatprep.subr.msk.mxu0 %vm157_vm0, %v42_v7  ;;  %1327 = vmatprep.mubr.msk.f32.mxu0 %vm157_vm0, %v45_v16  ;;  %v37_v23 = vld [vmem:[%s2084_s0 + $0x40] sm:$0xff]  ;;  %v63_v24 = vld [vmem:[%s2086_s2 + $0x10] sm:$0xff]  ;;  %v62_v25 = vld [vmem:[%s2086_s2 + $0x8] sm:$0xff] }
   0xb   :  { %139 = vperm.xlu1 %1434, %v73_v8   ;;  %v36_v26 = vld [vmem:[%s2084_s0 + $0x38] sm:$0xff]  ;;  %v61_v27 = vld [vmem:[%s2086_s2] sm:$0xff]  ;;  %v35_v29 = vld [vmem:[%s2084_s0 + $0x30] sm:$0xff] }
   0xc   :  { %v447_v28 = vld [vmem:[%s2088_s4] sm:$0xff]  ;;  %v448_v30 = vld [vmem:[%s2088_s4 + $0x8] sm:$0xff]  ;;  %v449_v31 = vld [vmem:[%s2088_s4 + $0x10] sm:$0xff] }
   0xd   :  { %134 = vperm.xlu0 %1433, %v72_v9   ;;  %1300 = vmatpush3.xpose.msk.msra.mxu0 %vm157_vm0, %v42_v7  ;;  %v34_v32 = vld [vmem:[%s2084_s0 + $0x28] sm:$0xff]  ;;  %v450_v33 = vld [vmem:[%s2088_s4 + $0x18] sm:$0xff] }
   0xe   :  { %1301 = vmatprep.subr.msk.mxu0 %vm157_vm0, %v41_v10 }
   0xf   :  { %129 = vperm.xlu1 %1434, %v71_v11  }
  0x11   :  { %124 = vperm.xlu0 %1433, %v70_v12   ;;  %1302 = vmatpush3.xpose.msk.msra.mxu0 %vm157_vm0, %v41_v10 }
  0x12   :  { %1303 = vmatprep.subr.msk.mxu0 %vm157_vm0, %v40_v13 }
  0x13   :  { %119 = vperm.xlu1 %1434, %v69_v14  }
  0x15   :  { %114 = vperm.xlu0 %1433, %v68_v15   ;;  %1304 = vmatpush3.xpose.msk.msra.mxu0 %vm157_vm0, %v40_v13 }
  0x16   :  { %1305 = vmatprep.subr.msk.mxu0 %vm157_vm0, %v39_v17 }
  0x17   :  { %109 = vperm.xlu1 %1434, %v67_v18  }
  0x19   :  { %104 = vperm.xlu0 %1433, %v66_v19   ;;  %1306 = vmatpush3.xpose.msk.msra.mxu0 %vm157_vm0, %v39_v17 }
  0x1a   :  { %1307 = vmatprep.subr.msk.mxu0 %vm157_vm0, %v38_v20 }
  0x1b   :  { %99 = vperm.xlu1 %1434, %v65_v21  }
  0x1d   :  { %94 = vperm.xlu0 %1433, %v64_v22   ;;  %1308 = vmatpush3.xpose.msk.msra.mxu0 %vm157_vm0, %v38_v20 }
  0x1e   :  { %1309 = vmatprep.subr.msk.mxu0 %vm157_vm0, %v37_v23 }
  0x1f   :  { %89 = vperm.xlu1 %1434, %v63_v24  }
  0x21   :  { %84 = vperm.xlu0 %1433, %v62_v25   ;;  %1310 = vmatpush3.xpose.msk.msra.mxu0 %vm157_vm0, %v37_v23 }
  0x22   :  { %1311 = vmatprep.subr.msk.mxu0 %vm157_vm0, %v36_v26 }
  0x23   :  { %79 = vperm.xlu1 %1434, %v61_v27  }
  0x25   :  { %481 = vperm.xlu0 %1433, %v447_v28   ;;  %1312 = vmatpush3.xpose.msk.msra.mxu0 %vm157_vm0, %v36_v26 }
  0x26   :  { %1313 = vmatprep.subr.msk.mxu0 %vm157_vm0, %v35_v29 }
  0x27   :  { %486 = vperm.xlu1 %1434, %v448_v30  }
  0x28   :  { %14 = vsyncpa [#allocation4], 0  ;;  %v451_v34 = vld [vmem:[%s2088_s4 + $0x20] sm:$0xff]  ;;  %v452_v36 = vld [vmem:[%s2088_s4 + $0x28] sm:$0xff] }
  0x29   :  { %491 = vperm.xlu0 %1433, %v449_v31   ;;  %1314 = vmatpush3.xpose.msk.msra.mxu0 %vm157_vm0, %v35_v29  ;;  %v33_v35 = vld [vmem:[%s2084_s0 + $0x20] sm:$0xff]  ;;  %v453_v37 = vld [vmem:[%s2088_s4 + $0x30] sm:$0xff]  ;;  %v32_v38 = vld [vmem:[%s2084_s0 + $0x18] sm:$0xff] }
  0x2a   :  { %1315 = vmatprep.subr.msk.mxu0 %vm157_vm0, %v34_v32  ;;  %v454_v39 = vld [vmem:[%s2088_s4 + $0x38] sm:$0xff]  ;;  %v455_v40 = vld [vmem:[%s2088_s4 + $0x40] sm:$0xff]  ;;  %v31_v41 = vld [vmem:[%s2084_s0 + $0x10] sm:$0xff] }
  0x2b   :  { %496 = vperm.xlu1 %1434, %v450_v33   ;;  %v456_v42 = vld [vmem:[%s2088_s4 + $0x48] sm:$0xff]  ;;  %v457_v43 = vld [vmem:[%s2088_s4 + $0x50] sm:$0xff]  ;;  %v458_v45 = vld [vmem:[%s2088_s4 + $0x58] sm:$0xff] }
  0x2c   :  { %v30_v44 = vld [vmem:[%s2084_s0 + $0x8] sm:$0xff]  ;;  %v459_v46 = vld [vmem:[%s2088_s4 + $0x60] sm:$0xff]  ;;  %v461_v49 = vld [vmem:[%s2088_s4 + $0x70] sm:$0xff] }
  0x2d   :  { %501 = vperm.xlu0 %1433, %v451_v34   ;;  %1316 = vmatpush3.xpose.msk.msra.mxu0 %vm157_vm0, %v34_v32  ;;  %v29_v47 = vld [vmem:[%s2084_s0] sm:$0xff]  ;;  %v460_v48 = vld [vmem:[%s2088_s4 + $0x68] sm:$0xff]  ;;  %v462_v50 = vld [vmem:[%s2088_s4 + $0x78] sm:$0xff] }
  0x2e   :  { %1317 = vmatprep.subr.msk.mxu0 %vm157_vm0, %v33_v35  ;;  %v46_v51 = vld [vmem:[%s2085_s1 + $0x8] sm:$0xff]  ;;  %v463_v52 = vld [vmem:[%s2088_s4 + $0x80] sm:$0xff]  ;;  %v47_v53 = vld [vmem:[%s2085_s1 + $0x10] sm:$0xff] }
  0x2f   :  { %506 = vperm.xlu1 %1434, %v452_v36   ;;  %v464_v54 = vld [vmem:[%s2088_s4 + $0x88] sm:$0xff]  ;;  %v48_v55 = vld [vmem:[%s2085_s1 + $0x18] sm:$0xff]  ;;  %v465_v56 = vld [vmem:[%s2088_s4 + $0x90] sm:$0xff] }
  0x30   :  { %v49_v57 = vld [vmem:[%s2085_s1 + $0x20] sm:$0xff]  ;;  %v466_v58 = vld [vmem:[%s2088_s4 + $0x98] sm:$0xff]  ;;  %v50_v59 = vld [vmem:[%s2085_s1 + $0x28] sm:$0xff] }
  0x31   :  { %511 = vperm.xlu0 %1433, %v453_v37   ;;  %1318 = vmatpush3.xpose.msk.msra.mxu0 %vm157_vm0, %v33_v35  ;;  %v467_v60 = vld [vmem:[%s2088_s4 + $0xa0] sm:$0xff]  ;;  %v51_v61 = vld [vmem:[%s2085_s1 + $0x30] sm:$0xff]  ;;  %v468_v62 = vld [vmem:[%s2088_s4 + $0xa8] sm:$0xff] }
  0x32   :  { %1319 = vmatprep.subr.msk.mxu0 %vm157_vm0, %v32_v38  ;;  %v52_v63 = vld [vmem:[%s2085_s1 + $0x38] sm:$0xff]  ;;  %v469_v0 = vld [vmem:[%s2088_s4 + $0xb0] sm:$0xff]  ;;  %v53_v1 = vld [vmem:[%s2085_s1 + $0x40] sm:$0xff] }
  0x33   :  { %516 = vperm.xlu1 %1434, %v454_v39   ;;  %v470_v2 = vld [vmem:[%s2088_s4 + $0xb8] sm:$0xff]  ;;  %v54_v3 = vld [vmem:[%s2085_s1 + $0x48] sm:$0xff]  ;;  %v471_v4 = vld [vmem:[%s2088_s4 + $0xc0] sm:$0xff] }
  0x34   :  { %v55_v5 = vld [vmem:[%s2085_s1 + $0x50] sm:$0xff]  ;;  %v472_v6 = vld [vmem:[%s2088_s4 + $0xc8] sm:$0xff]  ;;  %v56_v7 = vld [vmem:[%s2085_s1 + $0x58] sm:$0xff] }
  0x35   :  { %521 = vperm.xlu0 %1433, %v455_v40   ;;  %1320 = vmatpush3.xpose.msk.msra.mxu0 %vm157_vm0, %v32_v38  ;;  %v473_v8 = vld [vmem:[%s2088_s4 + $0xd0] sm:$0xff]  ;;  %v57_v9 = vld [vmem:[%s2085_s1 + $0x60] sm:$0xff]  ;;  %v474_v10 = vld [vmem:[%s2088_s4 + $0xd8] sm:$0xff] }
  0x36   :  { %1321 = vmatprep.subr.msk.mxu0 %vm157_vm0, %v31_v41  ;;  %v58_v11 = vld [vmem:[%s2085_s1 + $0x68] sm:$0xff]  ;;  %v475_v12 = vld [vmem:[%s2088_s4 + $0xe0] sm:$0xff]  ;;  %v59_v13 = vld [vmem:[%s2085_s1 + $0x70] sm:$0xff] }
  0x37   :  { %526 = vperm.xlu1 %1434, %v456_v42   ;;  %v476_v14 = vld [vmem:[%s2088_s4 + $0xe8] sm:$0xff]  ;;  %v60_v15 = vld [vmem:[%s2085_s1 + $0x78] sm:$0xff]  ;;  %v896_v16 = vld [vmem:[%s2089_s5] sm:$0xff] }
  0x38   :  { %v897_v17 = vld [vmem:[%s2089_s5 + $0x8] sm:$0xff]  ;;  %v898_v18 = vld [vmem:[%s2089_s5 + $0x10] sm:$0xff]  ;;  %v899_v19 = vld [vmem:[%s2089_s5 + $0x18] sm:$0xff] }
  0x39   :  { %531 = vperm.xlu0 %1433, %v457_v43   ;;  %1322 = vmatpush3.xpose.msk.msra.mxu0 %vm157_vm0, %v31_v41  ;;  %v900_v20 = vld [vmem:[%s2089_s5 + $0x20] sm:$0xff]  ;;  %v901_v21 = vld [vmem:[%s2089_s5 + $0x28] sm:$0xff]  ;;  %v902_v22 = vld [vmem:[%s2089_s5 + $0x30] sm:$0xff] }
  0x3a   :  { %1323 = vmatprep.subr.msk.mxu0 %vm157_vm0, %v30_v44  ;;  %v903_v23 = vld [vmem:[%s2089_s5 + $0x38] sm:$0xff]  ;;  %v904_v24 = vld [vmem:[%s2089_s5 + $0x40] sm:$0xff]  ;;  %v905_v25 = vld [vmem:[%s2089_s5 + $0x48] sm:$0xff] }
  0x3b   :  { %536 = vperm.xlu1 %1434, %v458_v45   ;;  %v906_v26 = vld [vmem:[%s2089_s5 + $0x50] sm:$0xff]  ;;  %v907_v27 = vld [vmem:[%s2089_s5 + $0x58] sm:$0xff]  ;;  %v908_v28 = vld [vmem:[%s2089_s5 + $0x60] sm:$0xff] }
  0x3c   :  { %v909_v29 = vld [vmem:[%s2089_s5 + $0x68] sm:$0xff]  ;;  %v910_v30 = vld [vmem:[%s2089_s5 + $0x70] sm:$0xff]  ;;  %v911_v31 = vld [vmem:[%s2089_s5 + $0x78] sm:$0xff] }
  0x3d   :  { %541 = vperm.xlu0 %1433, %v459_v46   ;;  %1324 = vmatpush3.xpose.msk.msra.mxu0 %vm157_vm0, %v30_v44  ;;  %v912_v32 = vld [vmem:[%s2089_s5 + $0x80] sm:$0xff]  ;;  %v913_v33 = vld [vmem:[%s2089_s5 + $0x88] sm:$0xff]  ;;  %v914_v34 = vld [vmem:[%s2089_s5 + $0x90] sm:$0xff] }
  0x3e   :  { %1325 = vmatprep.subr.msk.mxu0 %vm157_vm0, %v29_v47  ;;  %v915_v35 = vld [vmem:[%s2089_s5 + $0x98] sm:$0xff]  ;;  %v916_v36 = vld [vmem:[%s2089_s5 + $0xa0] sm:$0xff]  ;;  %v917_v37 = vld [vmem:[%s2089_s5 + $0xa8] sm:$0xff] }
  0x3f   :  { %546 = vperm.xlu1 %1434, %v460_v48   ;;  %v918_v38 = vld [vmem:[%s2089_s5 + $0xb0] sm:$0xff]  ;;  %v919_v39 = vld [vmem:[%s2089_s5 + $0xb8] sm:$0xff]  ;;  %v920_v40 = vld [vmem:[%s2089_s5 + $0xc0] sm:$0xff] }
  0x40   :  { %v921_v41 = vld [vmem:[%s2089_s5 + $0xc8] sm:$0xff]  ;;  %v922_v42 = vld [vmem:[%s2089_s5 + $0xd0] sm:$0xff]  ;;  %v923_v43 = vld [vmem:[%s2089_s5 + $0xd8] sm:$0xff] }
  0x41   :  { %551 = vperm.xlu0 %1433, %v461_v49   ;;  %1326 = vmatpush3.xpose.msk.msra.mxu0 %vm157_vm0, %v29_v47  ;;  %v477_v44 = vld [vmem:[%s2088_s4 + $0xf0] sm:$0xff]  ;;  %v924_v45 = vld [vmem:[%s2089_s5 + $0xe0] sm:$0xff]  ;;  %v478_v46 = vld [vmem:[%s2088_s4 + $0xf8] sm:$0xff] }
  0x42   :  { %v925_v47 = vld [vmem:[%s2089_s5 + $0xe8] sm:$0xff]  ;;  %v926_v48 = vld [vmem:[%s2089_s5 + $0xf0] sm:$0xff]  ;;  %v927_v49 = vld [vmem:[%s2089_s5 + $0xf8] sm:$0xff] }
  0x43   :  { %556 = vperm.xlu1 %1434, %v462_v50   ;;  %v1157_v50 = vld [vmem:[#allocation2] sm:$0x1] }
  0x44   :  { %1328 = vmatmul.mubr.msk.f32.vlgmr.msra.gmra.mxu0 %vm157_vm0, %v46_v51  ;;  %v415_v51 = vld [vmem:[%s2087_s3] sm:$0xff] }
  0x45   :  { %561 = vperm.xlu0 %1433, %v463_v52   ;;  %1330 = vmatprep.mubr.msk.f32.mxu0 %vm157_vm0, %v47_v53 }
  0x46   :  { %1383 = vmatprep.mubr.f32.mxu1 %v415_v51 }
  0x47   :  { %566 = vperm.xlu1 %1434, %v464_v54  }
  0x48   :  { %1331 = vmatmul.mubr.msk.f32.gmra.mxu0 %vm157_vm0, %v48_v55 }
  0x49   :  { %571 = vperm.xlu0 %1433, %v465_v56   ;;  %1333 = vmatprep.mubr.msk.f32.mxu0 %vm157_vm0, %v49_v57 }
  0x4b   :  { %576 = vperm.xlu1 %1434, %v466_v58  }
  0x4c   :  { %1334 = vmatmul.mubr.msk.f32.gmra.mxu0 %vm157_vm0, %v50_v59 }
  0x4d   :  { %581 = vperm.xlu0 %1433, %v467_v60   ;;  %1336 = vmatprep.mubr.msk.f32.mxu0 %vm157_vm0, %v51_v61 }
  0x4f   :  { %586 = vperm.xlu1 %1434, %v468_v62  }
  0x50   :  { %1337 = vmatmul.mubr.msk.f32.gmra.mxu0 %vm157_vm0, %v52_v63 }
  0x51   :  { %591 = vperm.xlu0 %1433, %v469_v0   ;;  %1339 = vmatprep.mubr.msk.f32.mxu0 %vm157_vm0, %v53_v1 }
  0x53   :  { %596 = vperm.xlu1 %1434, %v470_v2  }
  0x54   :  { %1340 = vmatmul.mubr.msk.f32.gmra.mxu0 %vm157_vm0, %v54_v3 }
  0x55   :  { %601 = vperm.xlu0 %1433, %v471_v4   ;;  %1342 = vmatprep.mubr.msk.f32.mxu0 %vm157_vm0, %v55_v5 }
  0x57   :  { %606 = vperm.xlu1 %1434, %v472_v6  }
  0x58   :  { %1343 = vmatmul.mubr.msk.f32.gmra.mxu0 %vm157_vm0, %v56_v7 }
  0x59   :  { %611 = vperm.xlu0 %1433, %v473_v8   ;;  %1345 = vmatprep.mubr.msk.f32.mxu0 %vm157_vm0, %v57_v9 }
  0x5b   :  { %616 = vperm.xlu1 %1434, %v474_v10  }
  0x5c   :  { %1346 = vmatmul.mubr.msk.f32.gmra.mxu0 %vm157_vm0, %v58_v11 }
  0x5d   :  { %621 = vperm.xlu0 %1433, %v475_v12   ;;  %1348 = vmatprep.mubr.msk.f32.mxu0 %vm157_vm0, %v59_v13 }
  0x5f   :  { %626 = vperm.xlu1 %1434, %v476_v14  }
  0x60   :  { %1349 = vmatmul.mubr.msk.f32.gmra.mxu0 %vm157_vm0, %v60_v15 }
  0x61   :  { %930 = vperm.xlu0 %1433, %v896_v16  }
  0x63   :  { %935 = vperm.xlu1 %1434, %v897_v17  }
  0x65   :  { %940 = vperm.xlu0 %1433, %v898_v18  }
  0x67   :  { %945 = vperm.xlu1 %1434, %v899_v19  }
  0x69   :  { %950 = vperm.xlu0 %1433, %v900_v20  }
  0x6b   :  { %955 = vperm.xlu1 %1434, %v901_v21  }
  0x6d   :  { %960 = vperm.xlu0 %1433, %v902_v22  }
  0x6f   :  { %965 = vperm.xlu1 %1434, %v903_v23  }
  0x71   :  { %970 = vperm.xlu0 %1433, %v904_v24  }
  0x73   :  { %975 = vperm.xlu1 %1434, %v905_v25  }
  0x75   :  { %980 = vperm.xlu0 %1433, %v906_v26  }
  0x77   :  { %985 = vperm.xlu1 %1434, %v907_v27  }
  0x79   :  { %990 = vperm.xlu0 %1433, %v908_v28  }
  0x7b   :  { %995 = vperm.xlu1 %1434, %v909_v29  }
  0x7d   :  { %1000 = vperm.xlu0 %1433, %v910_v30  }
  0x7f   :  { %1005 = vperm.xlu1 %1434, %v911_v31  }
  0x80   :  { %v155_v58 = vpop.permute.xlu0 %154 }
  0x81   :  { %1010 = vperm.xlu0 %1433, %v912_v32  }
  0x82   :  { %v145_v60 = vpop.permute.xlu1 %144 }
  0x83   :  { %1015 = vperm.xlu1 %1434, %v913_v33  }
  0x84   :  { %v150_v63 = vpop.permute.xlu0 %149 }
  0x85   :  { %1020 = vperm.xlu0 %1433, %v914_v34  }
  0x86   :  { %v140_v1 = vpop.permute.xlu1 %139 }
  0x87   :  { %1025 = vperm.xlu1 %1434, %v915_v35  }
  0x88   :  { %v135_v4 = vpop.permute.xlu0 %134 }
  0x89   :  { %1030 = vperm.xlu0 %1433, %v916_v36  }
  0x8a   :  { %v130_v6 = vpop.permute.xlu1 %129 }
  0x8b   :  { %1035 = vperm.xlu1 %1434, %v917_v37  }
  0x8c   :  { %v125_v10 = vpop.permute.xlu0 %124 }
  0x8d   :  { %1040 = vperm.xlu0 %1433, %v918_v38  }
  0x8e   :  { %v120_v15 = vpop.permute.xlu1 %119 }
  0x8f   :  { %1045 = vperm.xlu1 %1434, %v919_v39  }
  0x90   :  { %v115_v20 = vpop.permute.xlu0 %114 }
  0x91   :  { %1050 = vperm.xlu0 %1433, %v920_v40  }
  0x92   :  { %v110_v23 = vpop.permute.xlu1 %109 }
  0x93   :  { %1055 = vperm.xlu1 %1434, %v921_v41  }
  0x94   :  { %v105_v28 = vpop.permute.xlu0 %104 }
  0x95   :  { %1060 = vperm.xlu0 %1433, %v922_v42  }
  0x96   :  { %v100_v31 = vpop.permute.xlu1 %99 }
  0x97   :  { %1065 = vperm.xlu1 %1434, %v923_v43  }
  0x98   :  { %v95_v36 = vpop.permute.xlu0 %94 }
  0x99   :  { %631 = vperm.xlu0 %1433, %v477_v44  }
  0x9a   :  { %v90_v39 = vpop.permute.xlu1 %89 }
  0x9b   :  { %1070 = vperm.xlu1 %1434, %v924_v45  }
  0x9c   :  { %v85_v44 = vpop.permute.xlu0 %84 }
  0x9d   :  { %636 = vperm.xlu0 %1433, %v478_v46  }
  0x9f   :  { %1075 = vperm.xlu1 %1434, %v925_v47   ;;  %v80_v47 = vpop.permute.xlu1 %79 }
  0xa1   :  { %1080 = vperm.xlu0 %1433, %v926_v48  }
  0xa3   :  { %1085 = vperm.xlu1 %1434, %v927_v49  }
  0xa5   :  { %1160 = vperm.xlu0 %1433, %v1157_v50  }
 0x104   :  { %v1889_v52 = vpop.f32.mrf.mxu0 }
 0x105   :  { %v326_v45 = vadd.f32 %v1889_v52, %v85_v44  ;;  %v417_v52 = vld [vmem:[%s2087_s3 + $0x10] sm:$0xff] }
 0x106   :  { %v1891_v53 = vpop.f32.mrf.mxu0 }
 0x107   :  { %v321_v48 = vadd.f32 %v1891_v53, %v80_v47  ;;  %v400_v50 = vmax.f32 %v326_v45, 0.0  ;;  %v418_v53 = vld [vmem:[%s2087_s3 + $0x18] sm:$0xff] }
 0x108   :  { %v1893_v54 = vpop.f32.mrf.mxu0 }
 0x109   :  { %v336_v40 = vadd.f32 %v1893_v54, %v95_v36  ;;  %v399_v51 = vmax.f32 %v321_v48, 0.0  ;;  %v416_v54 = vld [vmem:[%s2087_s3 + $0x8] sm:$0xff] }
 0x10a   :  { %v1895_v55 = vpop.f32.mrf.mxu0 }
 0x10b   :  { %v331_v42 = vadd.f32 %v1895_v55, %v90_v39  ;;  %v402_v46 = vmax.f32 %v336_v40, 0.0  ;;  %v419_v55 = vld [vmem:[%s2087_s3 + $0x20] sm:$0xff] }
 0x10c   :  { %v1335_v56 = vpop.f32.mrf.mxu0 }
 0x10d   :  { %v346_v34 = vadd.f32 %v1335_v56, %v105_v28  ;;  %v401_v49 = vmax.f32 %v331_v42, 0.0  ;;  %v420_v56 = vld [vmem:[%s2087_s3 + $0x28] sm:$0xff] }
 0x10e   :  { %v340_v57 = vpop.f32.mrf.mxu0 }
 0x10f   :  { %v341_v37 = vadd.f32 %v340_v57, %v100_v31  ;;  %v404_v41 = vmax.f32 %v346_v34, 0.0  ;;  %v421_v57 = vld [vmem:[%s2087_s3 + $0x30] sm:$0xff] }
 0x110   :  { %v1338_v59 = vpop.f32.mrf.mxu0 }
 0x111   :  { %v356_v29 = vadd.f32 %v1338_v59, %v115_v20  ;;  %v403_v43 = vmax.f32 %v341_v37, 0.0  ;;  %v423_v59 = vld [vmem:[%s2087_s3 + $0x40] sm:$0xff]  ;;  %v487_v20 = vpop.permute.xlu1 %486 }
 0x112   :  { %v350_v61 = vpop.f32.mrf.mxu0 }
 0x113   :  { %v351_v32 = vadd.f32 %v350_v61, %v110_v23  ;;  %v406_v35 = vmax.f32 %v356_v29, 0.0  ;;  %v425_v61 = vld [vmem:[%s2087_s3 + $0x50] sm:$0xff] }
 0x114   :  { %v1341_v62 = vpop.f32.mrf.mxu0 }
 0x115   :  { %v366_v24 = vadd.f32 %v1341_v62, %v125_v10  ;;  %v405_v38 = vmax.f32 %v351_v32, 0.0  ;;  %v426_v62 = vld [vmem:[%s2087_s3 + $0x58] sm:$0xff] }
 0x116   :  { %v360_v0 = vpop.f32.mrf.mxu0  ;;  %v438_v10 = vld [vmem:[%s2087_s3 + $0xb8] sm:$0xff] }
 0x117   :  { %v361_v26 = vadd.f32 %v360_v0, %v120_v15  ;;  %v408_v30 = vmax.f32 %v366_v24, 0.0  ;;  %v428_v0 = vld [vmem:[%s2087_s3 + $0x68] sm:$0xff]  ;;  %v443_v15 = vld [vmem:[%s2087_s3 + $0xe0] sm:$0xff] }
 0x118   :  { %v1344_v2 = vpop.f32.mrf.mxu0 }
 0x119   :  { %v376_v18 = vadd.f32 %v1344_v2, %v135_v4  ;;  %v407_v33 = vmax.f32 %v361_v26, 0.0  ;;  %v430_v2 = vld [vmem:[%s2087_s3 + $0x78] sm:$0xff]  ;;  %v432_v4 = vld [vmem:[%s2087_s3 + $0x88] sm:$0xff] }
 0x11a   :  { %v370_v3 = vpop.f32.mrf.mxu0 }
 0x11b   :  { %v371_v21 = vadd.f32 %v370_v3, %v130_v6  ;;  %v410_v25 = vmax.f32 %v376_v18, 0.0  ;;  %v431_v3 = vld [vmem:[%s2087_s3 + $0x80] sm:$0xff]  ;;  %v434_v6 = vld [vmem:[%s2087_s3 + $0x98] sm:$0xff] }
 0x11c   :  { %v1347_v5 = vpop.f32.mrf.mxu0  ;;  %v446_v18 = vld [vmem:[%s2087_s3 + $0xf8] sm:$0xff] }
 0x11d   :  { %v386_v12 = vadd.f32 %v1347_v5, %v145_v60  ;;  %v409_v27 = vmax.f32 %v371_v21, 0.0  ;;  %v424_v60 = vld [vmem:[%s2087_s3 + $0x48] sm:$0xff]  ;;  %v433_v5 = vld [vmem:[%s2087_s3 + $0x90] sm:$0xff] }
 0x11e   :  { %v380_v7 = vpop.f32.mrf.mxu0 }
 0x11f   :  { %v381_v16 = vadd.f32 %v380_v7, %v140_v1  ;;  %v412_v19 = vmax.f32 %v386_v12, 0.0  ;;  %v429_v1 = vld [vmem:[%s2087_s3 + $0x70] sm:$0xff]  ;;  %v435_v7 = vld [vmem:[%s2087_s3 + $0xa0] sm:$0xff]  ;;  %v440_v12 = vld [vmem:[%s2087_s3 + $0xc8] sm:$0xff] }
 0x120   :  { %v1350_v8 = vpop.f32.mrf.mxu0 }
 0x121   :  { %v396_v9 = vadd.f32 %v1350_v8, %v155_v58  ;;  %v411_v22 = vmax.f32 %v381_v16, 0.0  ;;  %v422_v58 = vld [vmem:[%s2087_s3 + $0x38] sm:$0xff]  ;;  %v436_v8 = vld [vmem:[%s2087_s3 + $0xa8] sm:$0xff] }
 0x122   :  { %v390_v11 = vpop.f32.mrf.mxu0  ;;  %v444_v16 = vld [vmem:[%s2087_s3 + $0xe8] sm:$0xff] }
 0x123   :  { %v414_v13 = vmax.f32 %v396_v9, 0.0  ;;  %v391_v14 = vadd.f32 %v390_v11, %v150_v63  ;;  %v427_v63 = vld [vmem:[%s2087_s3 + $0x60] sm:$0xff]  ;;  %v437_v9 = vld [vmem:[%s2087_s3 + $0xb0] sm:$0xff] }
 0x124   :  { %v439_v11 = vld [vmem:[%s2087_s3 + $0xc0] sm:$0xff] }
 0x125   :  { %v413_v17 = vmax.f32 %v391_v14, 0.0  ;;  %1351 = vmatprep.subr.mxu1 %v414_v13  ;;  %v442_v14 = vld [vmem:[%s2087_s3 + $0xd8] sm:$0xff] }
 0x126   :  { %1352 = vmatpush3.msra.mxu1 %v414_v13  ;;  %v441_v13 = vld [vmem:[%s2087_s3 + $0xd0] sm:$0xff] }
 0x127   :  { %1353 = vmatprep.subr.mxu1 %v413_v17 }
 0x128   :  { %1354 = vmatpush3.msra.mxu1 %v413_v17  ;;  %v445_v17 = vld [vmem:[%s2087_s3 + $0xf0] sm:$0xff]  ;;  %s1458_s3 = smov [#allocation3]  }
 0x129   :  { %1355 = vmatprep.subr.mxu1 %v412_v19  ;;  %s1175_s23 = sshll.u32 %s1458_s3, 4  ;;  %s1176_s23 = int_to_ptr.vmem [resolvable:$true] %s1175_s23 }
 0x12a   :  { %1356 = vmatpush3.msra.mxu1 %v412_v19  ;;  %v482_v19 = vpop.permute.xlu0 %481  ;;  %s1435_s24 = scalar_lea.vmem %s1176_s23, 16  ;;  %s1439_s25 = scalar_lea.vmem %s1176_s23, 32 }
 0x12b   :  { %1357 = vmatprep.subr.mxu1 %v411_v22  ;;  %p1436_p0 = scmp.ne.s32.totalorder %s1176_s23, %s1435_s24  ;;  %p1440_p1 = scmp.lt.s32.totalorder %s1176_s23, %s1176_s23 }
 0x12c   :  { %1358 = vmatpush3.msra.mxu1 %v411_v22  ;;  %v497_v22 = vpop.permute.xlu1 %496  ;;  %p1441_p2 = scmp.lt.s32.totalorder %s1439_s25, %s1435_s24 }
 0x12d   :  { %1359 = vmatprep.subr.mxu1 %v410_v25 }
 0x12e   :  { %1360 = vmatpush3.msra.mxu1 %v410_v25  ;;  %v492_v21 = vpop.permute.xlu0 %491  ;;  %p1442_p3 = por %p1441_p2, %p1440_p1 }
 0x12f   :  { %1361 = vmatprep.subr.mxu1 %v409_v27 }
 0x130   :  { %1362 = vmatpush3.msra.mxu1 %v409_v27  ;;  %v507_v24 = vpop.permute.xlu1 %506  ;;  %p1443_p4 = pnand %p1442_p3, %p1436_p0 }
 0x131   :  { %1363 = vmatprep.subr.mxu1 %v408_v30 }
 0x132   :  { %1364 = vmatpush3.msra.mxu1 %v408_v30  ;;  %v502_v23 = vpop.permute.xlu0 %501 }
 0x133   :  { %1365 = vmatprep.subr.mxu1 %v407_v33 }
 0x134   :  { %1366 = vmatpush3.msra.mxu1 %v407_v33  ;;  %v1996_v26 = vpop.permute.xlu1 %516 }
 0x135   :  { %1367 = vmatprep.subr.mxu1 %v406_v35 }
 0x136   :  { %1368 = vmatpush3.msra.mxu1 %v406_v35  ;;  %v1994_v25 = vpop.permute.xlu0 %511 }
 0x137   :  { %1369 = vmatprep.subr.mxu1 %v405_v38 }
 0x138   :  { %1370 = vmatpush3.msra.mxu1 %v405_v38  ;;  %v2000_v28 = vpop.permute.xlu1 %526 }
 0x139   :  { %1371 = vmatprep.subr.mxu1 %v404_v41 }
 0x13a   :  { %1372 = vmatpush3.msra.mxu1 %v404_v41  ;;  %v1998_v27 = vpop.permute.xlu0 %521 }
 0x13b   :  { %1373 = vmatprep.subr.mxu1 %v403_v43 }
 0x13c   :  { %1374 = vmatpush3.msra.mxu1 %v403_v43  ;;  %v2004_v30 = vpop.permute.xlu1 %536 }
 0x13d   :  { %1375 = vmatprep.subr.mxu1 %v402_v46 }
 0x13e   :  { %1376 = vmatpush3.msra.mxu1 %v402_v46  ;;  %v2002_v29 = vpop.permute.xlu0 %531 }
 0x13f   :  { %1377 = vmatprep.subr.mxu1 %v401_v49 }
 0x140   :  { %1378 = vmatpush3.msra.mxu1 %v401_v49  ;;  %v2008_v32 = vpop.permute.xlu1 %546 }
 0x141   :  { %1379 = vmatprep.subr.mxu1 %v400_v50 }
 0x142   :  { %1380 = vmatpush3.msra.mxu1 %v400_v50  ;;  %v2006_v31 = vpop.permute.xlu0 %541 }
 0x143   :  { %1381 = vmatprep.subr.mxu1 %v399_v51 }
 0x144   :  { %1382 = vmatpush3.msra.mxu1 %v399_v51  ;;  %v2012_v34 = vpop.permute.xlu1 %556 }
 0x145   :  { %1384 = vmatmul.mubr.f32.vlgmr.msra.gmra.mxu1 %v416_v54 }
 0x146   :  { %1386 = vmatprep.mubr.f32.mxu1 %v417_v52  ;;  %v2010_v33 = vpop.permute.xlu0 %551 }
 0x148   :  { %v2016_v36 = vpop.permute.xlu1 %566 }
 0x149   :  { %1387 = vmatmul.mubr.f32.gmra.mxu1 %v418_v53 }
 0x14a   :  { %1389 = vmatprep.mubr.f32.mxu1 %v419_v55  ;;  %v2014_v35 = vpop.permute.xlu0 %561 }
 0x14c   :  { %v2020_v38 = vpop.permute.xlu1 %576 }
 0x14d   :  { %1390 = vmatmul.mubr.f32.gmra.mxu1 %v420_v56 }
 0x14e   :  { %1392 = vmatprep.mubr.f32.mxu1 %v421_v57  ;;  %v2018_v37 = vpop.permute.xlu0 %571 }
 0x150   :  { %v2024_v40 = vpop.permute.xlu1 %586 }
 0x151   :  { %1393 = vmatmul.mubr.f32.gmra.mxu1 %v422_v58 }
 0x152   :  { %1395 = vmatprep.mubr.f32.mxu1 %v423_v59  ;;  %v2022_v39 = vpop.permute.xlu0 %581 }
 0x154   :  { %v2028_v42 = vpop.permute.xlu1 %596 }
 0x155   :  { %1396 = vmatmul.mubr.f32.gmra.mxu1 %v424_v60 }
 0x156   :  { %1398 = vmatprep.mubr.f32.mxu1 %v425_v61  ;;  %v2026_v41 = vpop.permute.xlu0 %591 }
 0x158   :  { %v2032_v44 = vpop.permute.xlu1 %606 }
 0x159   :  { %1399 = vmatmul.mubr.f32.gmra.mxu1 %v426_v62 }
 0x15a   :  { %1401 = vmatprep.mubr.f32.mxu1 %v427_v63  ;;  %v2030_v43 = vpop.permute.xlu0 %601 }
 0x15c   :  { %v2036_v46 = vpop.permute.xlu1 %616 }
 0x15d   :  { %1402 = vmatmul.mubr.f32.gmra.mxu1 %v428_v0 }
 0x15e   :  { %1404 = vmatprep.mubr.f32.mxu1 %v429_v1  ;;  %v2034_v45 = vpop.permute.xlu0 %611 }
 0x160   :  { %v2040_v48 = vpop.permute.xlu1 %626 }
 0x161   :  { %1405 = vmatmul.mubr.f32.gmra.mxu1 %v430_v2 }
 0x162   :  { %1407 = vmatprep.mubr.f32.mxu1 %v431_v3  ;;  %v2038_v47 = vpop.permute.xlu0 %621 }
 0x164   :  { %v936_v50 = vpop.permute.xlu1 %935 }
 0x165   :  { %1408 = vmatmul.mubr.f32.gmra.mxu1 %v432_v4 }
 0x166   :  { %1410 = vmatprep.mubr.f32.mxu1 %v433_v5  ;;  %v931_v49 = vpop.permute.xlu0 %930 }
 0x168   :  { %v946_v54 = vpop.permute.xlu1 %945 }
 0x169   :  { %1411 = vmatmul.mubr.f32.gmra.mxu1 %v434_v6 }
 0x16a   :  { %1413 = vmatprep.mubr.f32.mxu1 %v435_v7  ;;  %v941_v51 = vpop.permute.xlu0 %940 }
 0x16c   :  { %v956_v53 = vpop.permute.xlu1 %955 }
 0x16d   :  { %1414 = vmatmul.mubr.f32.gmra.mxu1 %v436_v8 }
 0x16e   :  { %1416 = vmatprep.mubr.f32.mxu1 %v437_v9  ;;  %v951_v52 = vpop.permute.xlu0 %950 }
 0x170   :  { %v966_v56 = vpop.permute.xlu1 %965 }
 0x171   :  { %1417 = vmatmul.mubr.f32.gmra.mxu1 %v438_v10 }
 0x172   :  { %1419 = vmatprep.mubr.f32.mxu1 %v439_v11  ;;  %v961_v55 = vpop.permute.xlu0 %960 }
 0x174   :  { %v976_v58 = vpop.permute.xlu1 %975 }
 0x175   :  { %1420 = vmatmul.mubr.f32.gmra.mxu1 %v440_v12 }
 0x176   :  { %1422 = vmatprep.mubr.f32.mxu1 %v441_v13  ;;  %v971_v57 = vpop.permute.xlu0 %970 }
 0x178   :  { %v2044_v62 = vpop.permute.xlu1 %985 }
 0x179   :  { %1423 = vmatmul.mubr.f32.gmra.mxu1 %v442_v14 }
 0x17a   :  { %1425 = vmatprep.mubr.f32.mxu1 %v443_v15  ;;  %v2042_v59 = vpop.permute.xlu0 %980 }
 0x17c   :  { %v2048_v9 = vpop.permute.xlu1 %995 }
 0x17d   :  { %1426 = vmatmul.mubr.f32.gmra.mxu1 %v444_v16 }
 0x17e   :  { %1428 = vmatprep.mubr.f32.mxu1 %v445_v17  ;;  %v2046_v5 = vpop.permute.xlu0 %990 }
 0x181   :  { %1429 = vmatmul.mubr.f32.gmra.mxu1 %v446_v18 }
 0x205   :  { %v1385_v60 = vpop.f32.mrf.mxu1 }
 0x206   :  { %v711_v61 = vadd.f32 %v1385_v60, %v487_v20 }
 0x207   :  { %v705_v63 = vpop.f32.mrf.mxu1 }
 0x208   :  { %v706_v0 = vadd.f32 %v705_v63, %v482_v19  ;;  %v865_v2 = vmax.f32 %v711_v61, 0.0  ;;  %v2050_v19 = vpop.permute.xlu0 %1000 }
 0x209   :  { %v1388_v1 = vpop.f32.mrf.mxu1 }
 0x20a   :  { %v864_v3 = vmax.f32 %v706_v0, 0.0  ;;  %v721_v4 = vadd.f32 %v1388_v1, %v497_v22  ;;  %v1089_v12 = vmul.f32 %v936_v50, %v865_v2 }
 0x20b   :  { %v715_v6 = vpop.f32.mrf.mxu1 }
 0x20c   :  { %v1088_v7 = vmul.f32 %v931_v49, %v864_v3  ;;  %v716_v8 = vadd.f32 %v715_v6, %v492_v21  ;;  %v867_v10 = vmax.f32 %v721_v4, 0.0  ;;  %v1006_v49 = vpop.permute.xlu1 %1005 }
 0x20d   :  { %v1391_v11 = vpop.f32.mrf.mxu1 }
 0x20e   :  { %v866_v13 = vmax.f32 %v716_v8, 0.0  ;;  %v731_v14 = vadd.f32 %v1391_v11, %v507_v24  ;;  %v1120_v16 = vadd.f32 %v1089_v12, %v1088_v7  ;;  %v1091_v20 = vmul.f32 %v946_v54, %v867_v10  ;;  %v1011_v54 = vpop.permute.xlu0 %1010 }
 0x20f   :  { %v725_v15 = vpop.f32.mrf.mxu1 }
 0x210   :  { %v1090_v17 = vmul.f32 %v941_v51, %v866_v13  ;;  %v726_v18 = vadd.f32 %v725_v15, %v502_v23  ;;  %v869_v61 = vmax.f32 %v731_v14, 0.0 }
 0x211   :  { %v1394_v22 = vpop.f32.mrf.mxu1 }
 0x212   :  { %v1121_v60 = vadd.f32 %v1120_v16, %v1090_v17  ;;  %v868_v63 = vmax.f32 %v726_v18, 0.0  ;;  %v741_v21 = vadd.f32 %v1394_v22, %v1996_v26  ;;  %v1093_v4 = vmul.f32 %v956_v53, %v869_v61  ;;  %v1016_v26 = vpop.permute.xlu1 %1015 }
 0x213   :  { %v735_v0 = vpop.f32.mrf.mxu1 }
 0x214   :  { %v1092_v1 = vmul.f32 %v951_v52, %v868_v63  ;;  %v1122_v3 = vadd.f32 %v1121_v60, %v1091_v20  ;;  %v736_v50 = vadd.f32 %v735_v0, %v1994_v25  ;;  %v871_v24 = vmax.f32 %v741_v21, 0.0 }
 0x215   :  { %v1397_v2 = vpop.f32.mrf.mxu1 }
 0x216   :  { %v1123_v51 = vadd.f32 %v1122_v3, %v1092_v1  ;;  %v870_v23 = vmax.f32 %v736_v50, 0.0  ;;  %v751_v6 = vadd.f32 %v1397_v2, %v2000_v28  ;;  %v1095_v12 = vmul.f32 %v966_v56, %v871_v24  ;;  %v1021_v28 = vpop.permute.xlu0 %1020  ;;  %v1026_v56 = vpop.permute.xlu1 %1025 }
 0x217   :  { %v745_v7 = vpop.f32.mrf.mxu1 }
 0x218   :  { %v1094_v8 = vmul.f32 %v961_v55, %v870_v23  ;;  %v1124_v10 = vadd.f32 %v1123_v51, %v1093_v4  ;;  %v746_v11 = vadd.f32 %v745_v7, %v1998_v27  ;;  %v873_v14 = vmax.f32 %v751_v6, 0.0 }
 0x219   :  { %v1400_v13 = vpop.f32.mrf.mxu1 }
 0x21a   :  { %v1125_v52 = vadd.f32 %v1124_v10, %v1094_v8  ;;  %v872_v15 = vmax.f32 %v746_v11, 0.0  ;;  %v761_v25 = vadd.f32 %v1400_v13, %v2004_v30  ;;  %v1097_v55 = vmul.f32 %v976_v58, %v873_v14  ;;  %v1031_v58 = vpop.permute.xlu0 %1030  ;;  %v1036_v23 = vpop.permute.xlu1 %1035 }
 0x21b   :  { %v755_v16 = vpop.f32.mrf.mxu1 }
 0x21c   :  { %v1096_v53 = vmul.f32 %v971_v57, %v872_v15  ;;  %v1126_v17 = vadd.f32 %v1125_v52, %v1095_v12  ;;  %v756_v18 = vadd.f32 %v755_v16, %v2002_v29  ;;  %v875_v20 = vmax.f32 %v761_v25, 0.0 }
 0x21d   :  { %v1403_v22 = vpop.f32.mrf.mxu1 }
 0x21e   :  { %v1127_v60 = vadd.f32 %v1126_v17, %v1096_v53  ;;  %v874_v61 = vmax.f32 %v756_v18, 0.0  ;;  %v771_v27 = vadd.f32 %v1403_v22, %v2008_v32  ;;  %v1099_v57 = vmul.f32 %v2044_v62, %v875_v20  ;;  %v1041_v13 = vpop.permute.xlu0 %1040  ;;  %v1046_v16 = vpop.permute.xlu1 %1045 }
 0x21f   :  { %v765_v63 = vpop.f32.mrf.mxu1 }
 0x220   :  { %v1098_v21 = vmul.f32 %v2042_v59, %v874_v61  ;;  %v1128_v0 = vadd.f32 %v1127_v60, %v1097_v55  ;;  %v766_v30 = vadd.f32 %v765_v63, %v2006_v31  ;;  %v877_v29 = vmax.f32 %v771_v27, 0.0 }
 0x221   :  { %v1406_v1 = vpop.f32.mrf.mxu1 }
 0x222   :  { %v1129_v3 = vadd.f32 %v1128_v0, %v1098_v21  ;;  %v876_v50 = vmax.f32 %v766_v30, 0.0  ;;  %v781_v24 = vadd.f32 %v1406_v1, %v2012_v34  ;;  %v1101_v31 = vmul.f32 %v2048_v9, %v877_v29 }
 0x223   :  { %v775_v2 = vpop.f32.mrf.mxu1 }
 0x224   :  { %v1100_v4 = vmul.f32 %v2046_v5, %v876_v50  ;;  %v1130_v32 = vadd.f32 %v1129_v3, %v1099_v57  ;;  %v776_v51 = vadd.f32 %v775_v2, %v2010_v33  ;;  %v879_v59 = vmax.f32 %v781_v24, 0.0 }
 0x225   :  { %v1409_v6 = vpop.f32.mrf.mxu1 }
 0x226   :  { %v1131_v7 = vadd.f32 %v1130_v32, %v1100_v4  ;;  %v878_v62 = vmax.f32 %v776_v51, 0.0  ;;  %v791_v8 = vadd.f32 %v1409_v6, %v2016_v36  ;;  %v1103_v5 = vmul.f32 %v1006_v49, %v879_v59  ;;  %v1051_v49 = vpop.permute.xlu0 %1050 }
 0x227   :  { %v785_v10 = vpop.f32.mrf.mxu1 }
 0x228   :  { %v1102_v11 = vmul.f32 %v2050_v19, %v878_v62  ;;  %v1132_v34 = vadd.f32 %v1131_v7, %v1101_v31  ;;  %v786_v12 = vadd.f32 %v785_v10, %v2014_v35  ;;  %v881_v33 = vmax.f32 %v791_v8, 0.0 }
 0x229   :  { %v1412_v52 = vpop.f32.mrf.mxu1 }
 0x22a   :  { %v1133_v14 = vadd.f32 %v1132_v34, %v1102_v11  ;;  %v880_v15 = vmax.f32 %v786_v12, 0.0  ;;  %v801_v25 = vadd.f32 %v1412_v52, %v2020_v38  ;;  %v1105_v19 = vmul.f32 %v1016_v26, %v881_v33  ;;  %v1056_v38 = vpop.permute.xlu1 %1055 }
 0x22b   :  { %v795_v9 = vpop.f32.mrf.mxu1 }
 0x22c   :  { %v1104_v53 = vmul.f32 %v1011_v54, %v880_v15  ;;  %v1134_v17 = vadd.f32 %v1133_v14, %v1103_v5  ;;  %v796_v36 = vadd.f32 %v795_v9, %v2018_v37  ;;  %v883_v18 = vmax.f32 %v801_v25, 0.0 }
 0x22d   :  { %v1415_v20 = vpop.f32.mrf.mxu1 }
 0x22e   :  { %v1135_v22 = vadd.f32 %v1134_v17, %v1104_v53  ;;  %v882_v55 = vmax.f32 %v796_v36, 0.0  ;;  %v811_v35 = vadd.f32 %v1415_v20, %v2024_v40  ;;  %v1107_v21 = vmul.f32 %v1026_v56, %v883_v18  ;;  %v1061_v40 = vpop.permute.xlu0 %1060  ;;  %v1066_v56 = vpop.permute.xlu1 %1065 }
 0x22f   :  { %v805_v60 = vpop.f32.mrf.mxu1 }
 0x230   :  { %v1106_v61 = vmul.f32 %v1021_v28, %v882_v55  ;;  %v1136_v27 = vadd.f32 %v1135_v22, %v1105_v19  ;;  %v806_v63 = vadd.f32 %v805_v60, %v2022_v39  ;;  %v885_v30 = vmax.f32 %v811_v35, 0.0 }
 0x231   :  { %v1418_v0 = vpop.f32.mrf.mxu1 }
 0x232   :  { %v1137_v54 = vadd.f32 %v1136_v27, %v1106_v61  ;;  %v884_v57 = vmax.f32 %v806_v63, 0.0  ;;  %v821_v37 = vadd.f32 %v1418_v0, %v2028_v42  ;;  %v1109_v28 = vmul.f32 %v1036_v23, %v885_v30  ;;  %v632_v8 = vpop.permute.xlu0 %631 }
 0x233   :  { %v815_v1 = vpop.f32.mrf.mxu1 }
 0x234   :  { %v1108_v26 = vmul.f32 %v1031_v58, %v884_v57  ;;  %v1138_v3 = vadd.f32 %v1137_v54, %v1107_v21  ;;  %v816_v29 = vadd.f32 %v815_v1, %v2026_v41  ;;  %v887_v50 = vmax.f32 %v821_v37, 0.0 }
 0x235   :  { %v1421_v24 = vpop.f32.mrf.mxu1  ;;  %v1163_v54 = vlaneseq }
 0x236   :  { %v1139_v2 = vadd.f32 %v1138_v3, %v1108_v26  ;;  %v886_v4 = vmax.f32 %v816_v29, 0.0  ;;  %v831_v39 = vadd.f32 %v1421_v24, %v2032_v44  ;;  %v1111_v42 = vmul.f32 %v1046_v16, %v887_v50  ;;  %v1071_v44 = vpop.permute.xlu1 %1070 }
 0x237   :  { %v825_v32 = vpop.f32.mrf.mxu1  ;;  %v1164_v37 = vshrl.u32 %v1163_v54, 7 }
 0x238   :  { %v1110_v51 = vmul.f32 %v1041_v13, %v886_v4  ;;  %v1140_v59 = vadd.f32 %v1139_v2, %v1109_v28  ;;  %v826_v6 = vadd.f32 %v825_v32, %v2030_v43  ;;  %v889_v7 = vmax.f32 %v831_v39, 0.0 }
 0x239   :  { %v1424_v31 = vpop.f32.mrf.mxu1  ;;  %v1165_v3 = vsub.s32 0, %v1164_v37 }
 0x23a   :  { %v1141_v58 = vadd.f32 %v1140_v59, %v1110_v51  ;;  %v888_v62 = vmax.f32 %v826_v6, 0.0  ;;  %v841_v41 = vadd.f32 %v1424_v31, %v2036_v46  ;;  %v1113_v13 = vmul.f32 %v1056_v38, %v889_v7  ;;  %v637_v46 = vpop.permute.xlu0 %636  ;;  %v1076_v20 = vpop.permute.xlu1 %1075 }
 0x23b   :  { %v835_v10 = vpop.f32.mrf.mxu1 }
 0x23c   :  { %v1112_v23 = vmul.f32 %v1051_v49, %v888_v62  ;;  %v1142_v11 = vadd.f32 %v1141_v58, %v1111_v42  ;;  %v836_v34 = vadd.f32 %v835_v10, %v2034_v45  ;;  %v891_v12 = vmax.f32 %v841_v41, 0.0 }
 0x23d   :  { %v1427_v5 = vpop.f32.mrf.mxu1 }
 0x23e   :  { %v1143_v52 = vadd.f32 %v1142_v11, %v1112_v23  ;;  %v890_v14 = vmax.f32 %v836_v34, 0.0  ;;  %v851_v43 = vadd.f32 %v1427_v5, %v2040_v48  ;;  %v1115_v9 = vmul.f32 %v1066_v56, %v891_v12  ;;  %v1081_v27 = vpop.permute.xlu0 %1080 }
 0x23f   :  { %v845_v33 = vpop.f32.mrf.mxu1 }
 0x240   :  { %v1114_v15 = vmul.f32 %v1061_v40, %v890_v14  ;;  %v1144_v25 = vadd.f32 %v1143_v52, %v1113_v13  ;;  %v846_v16 = vadd.f32 %v845_v33, %v2038_v47  ;;  %v893_v36 = vmax.f32 %v851_v43, 0.0  ;;  %v1086_v47 = vpop.permute.xlu1 %1085 }
 0x241   :  { %v1430_v53 = vpop.f32.mrf.mxu1 }
 0x242   :  { %v1145_v17 = vadd.f32 %v1144_v25, %v1114_v15  ;;  %v892_v18 = vmax.f32 %v846_v16, 0.0  ;;  %v861_v45 = vadd.f32 %v1430_v53, %v637_v46  ;;  %v1117_v49 = vmul.f32 %v1076_v20, %v893_v36  ;;  %v1161_v40 = vpop.permute.xlu0 %1160 }
 0x243   :  { %v855_v19 = vpop.f32.mrf.mxu1  ;;  %v1166_v24 = vrot.slane %v1161_v40, %v1165_v3 }
 0x244   :  { %v1116_v22 = vmul.f32 %v1071_v44, %v892_v18  ;;  %v1146_v55 = vadd.f32 %v1145_v17, %v1115_v9  ;;  %v856_v35 = vadd.f32 %v855_v19, %v632_v8  ;;  %v895_v48 = vmax.f32 %v861_v45, 0.0 }
 0x246   :  { %v1147_v60 = vadd.f32 %v1146_v55, %v1116_v22  ;;  %v894_v61 = vmax.f32 %v856_v35, 0.0  ;;  %v1119_v21 = vmul.f32 %v1086_v47, %v895_v48 }
 0x248   :  { %v1118_v63 = vmul.f32 %v1081_v27, %v894_v61  ;;  %v1148_v38 = vadd.f32 %v1147_v60, %v1117_v49 }
 0x24a   :  { %v1149_v0 = vadd.f32 %v1148_v38, %v1118_v63 }
 0x24c   :  { %v1150_v30 = vadd.f32 %v1149_v0, %v1119_v21 }
 0x24e   :  { %v1151_v57 = vrot.slane %v1150_v30, 4 }
 0x250   :  { %v1152_v1 = vadd.f32 %v1151_v57, %v1150_v30 }
 0x252   :  { %v1153_v26 = vrot.slane %v1152_v1, 2 }
 0x254   :  { %v1154_v29 = vadd.f32 %v1153_v26, %v1152_v1 }
 0x256   :  { %v1155_v50 = vrot.slane %v1154_v29, 1 }
 0x258   :  { %v1156_v28 = vadd.f32 %v1155_v50, %v1154_v29 }
 0x25a   :  { %v1167_v2 = vadd.f32 %v1166_v24, %v1156_v28 }
 0x25c   :  { %1168 = vst [vmem:[#allocation3] sm:$0x1] %v1167_v2 }
 0x25d   :  { %1446 = shalt.err (!%p1443_p4)
}
 0x25e   :  { %1178 = dma.vmem_to_hbm [thread:$0]  %s1176_s23, 16, %s2091_s7, [#allocation4]  }
 0x25f   :  { %1455 = dma.done.wait [#allocation4], 16  }
 0x260   :  { %1456 = vsyncadd [#allocation4], 4294967280 }
 0x261   :  { %1182 = vsyncpa [#allocation4], 1 }

</bundles_post_ra>
